<compile_context>
chip_gen: v5e
topology: v5e:2x2
jax: 0.10.0
libtpu: 0.0.40
codegen_flags: <defaults>
</compile_context>

<pallas_src>
import math

import jax
import jax.numpy as jnp
from jax.experimental import pallas as pl
from jax.experimental.pallas import tpu as pltpu


def _round_up(n, m):
    return ((n + m - 1) // m) * m


def _vmem_capacity_bytes():
    """Physical VMEM of the local chip; conservative fallback if unqueryable."""
    try:
        info = pltpu.get_tpu_info()
        cap = getattr(info, "vmem_capacity_bytes", None)
        if cap:
            return int(cap)
    except Exception:
        pass
    return 64 << 20  # assume the smallest (v7x) if we cannot query


def _vmem_budget_bytes(block_b, din, h, c):
    """Explicit VMEM budget for the chosen tiling, with headroom for Mosaic."""
    bf16, f32 = 2, 4
    x_io = 2 * block_b * din * f32               # double-buffered f32 input tile
    out_io = 2 * block_b * c * f32               # double-buffered output tile
    weights = (din * h + h * h + h * c) * bf16   # single-buffered bf16 weights
    biases = (2 * h + c) * f32
    live_h = 2 * block_b * h * f32               # f32 hidden intermediates / spill
    budget = int(1.5 * (x_io + out_io + weights + biases + live_h)) + (8 << 20)
    cap = _vmem_capacity_bytes()
    headroom = max(cap - (16 << 20), 32 << 20)   # never ask for the full chip
    return max(min(budget, headroom), min(32 << 20, headroom))


def _choose_block_b(B, requested):
    """Batch tile: multiple of 128 for large batches (full MXU passes), else
    multiple of 8; clamped to the batch, and shrunk when needed so the grid
    has >= 2 steps (lets the 'parallel' axis shard across v7x's 2 TCs)."""
    gran = 128 if B >= 256 else 8
    blk = _round_up(max(gran, min(requested, B)), gran)
    if pl.cdiv(B, blk) < 2 and B > gran:
        blk = _round_up(pl.cdiv(B, 2), gran)
    return max(gran, min(blk, _round_up(B, gran)))


def ddisc_kernel(x_ref, w0_ref, b0_ref, w1_ref, b1_ref, w2_ref, b2_ref, out_ref):
    # Cast the f32 input tile to bf16 in-kernel (hidden under MXU compute);
    # all matmuls: bf16 MXU inputs, f32 accumulation. Elementwise stays f32.
    x = x_ref[...].astype(jnp.bfloat16)

    # Layer 0: Linear + ReLU (Dropout is identity in eval mode).
    h = jnp.dot(x, w0_ref[...], preferred_element_type=jnp.float32)
    h = jnp.maximum(h + b0_ref[...], 0.0)

    # Layer 1: Linear + ReLU.
    h = jnp.dot(h.astype(jnp.bfloat16), w1_ref[...],
                preferred_element_type=jnp.float32)
    h = jnp.maximum(h + b1_ref[...], 0.0)

    # Final classifier Linear.
    logits = jnp.dot(h.astype(jnp.bfloat16), w2_ref[...],
                     preferred_element_type=jnp.float32) + b2_ref[...]

    # log_softmax over the class (last) axis, in f32.
    m = jnp.max(logits, axis=-1, keepdims=True)
    shifted = logits - m
    lse = jnp.log(jnp.sum(jnp.exp(shifted), axis=-1, keepdims=True))
    out_ref[...] = (shifted - lse).astype(out_ref.dtype)


def prepare_params(params):
    """Hoist the weight f32->bf16 casts out of the per-call path (do once)."""
    w0, b0, w1, b1, w2, b2 = params
    return (w0.astype(jnp.bfloat16), b0,
            w1.astype(jnp.bfloat16), b1,
            w2.astype(jnp.bfloat16), b2)


def domain_discriminator(x, params, *, block_b=1024):
    """x: [B, input_size] float32.
    params: (w0, b0, w1, b1, w2, b2) with w_i [in, out] (PyTorch weights
    transposed), b_i [1, out]. Weights may already be bf16 (prepare_params)."""
    w0, b0, w1, b1, w2, b2 = params
    B, Din = x.shape
    H = w0.shape[1]
    C = w2.shape[1]

    # No-ops if prepare_params() already cast the weights to bf16.
    w0b = w0.astype(jnp.bfloat16)
    w1b = w1.astype(jnp.bfloat16)
    w2b = w2.astype(jnp.bfloat16)

    blk = _choose_block_b(B, block_b)
    grid = (pl.cdiv(B, blk),)   # tail handled by Pallas partial last block

    # Grid-invariant weights/biases: constant index_map, single buffer.
    def const_spec(shape):
        return pl.BlockSpec(shape, lambda i: (0, 0),
                            pipeline_mode=pl.Buffered(1))

    cost = pl.CostEstimate(
        flops=2 * B * (Din * H + H * H + H * C),
        transcendentals=B * (C + 1),
        bytes_accessed=(B * Din * 4 + B * C * 4
                        + (Din * H + H * H + H * C) * 2 + (2 * H + C) * 4),
    )

    return pl.pallas_call(
        ddisc_kernel,
        out_shape=jax.ShapeDtypeStruct((B, C), jnp.float32),
        grid_spec=pltpu.PrefetchScalarGridSpec(
            num_scalar_prefetch=0,
            grid=grid,
            in_specs=[
                pl.BlockSpec((blk, Din), lambda i: (i, 0)),  # f32 x tile (2-buf)
                const_spec((Din, H)),
                const_spec((1, H)),
                const_spec((H, H)),
                const_spec((1, H)),
                const_spec((H, C)),
                const_spec((1, C)),
            ],
            out_specs=pl.BlockSpec((blk, C), lambda i: (i, 0)),
        ),
        compiler_params=pltpu.CompilerParams(
            dimension_semantics=("parallel",),
            vmem_limit_bytes=_vmem_budget_bytes(blk, Din, H, C),
        ),
        cost_estimate=cost,
    )(x, w0b, b0, w1b, b1, w2b, b2)


def init_params(key, input_size, hidden_size, num_classes):
    """Deterministic PyTorch-style (Kaiming-uniform-ish) init; weights already
    transposed to [in, out], biases [1, out], all f32."""
    def linear(k, fan_in, fan_out):
        kw, kb = jax.random.split(k)
        bound = 1.0 / math.sqrt(fan_in)
        w = jax.random.uniform(kw, (fan_in, fan_out), jnp.float32, -bound, bound)
        b = jax.random.uniform(kb, (1, fan_out), jnp.float32, -bound, bound)
        return w, b

    k0, k1, k2 = jax.random.split(key, 3)
    w0, b0 = linear(k0, input_size, hidden_size)
    w1, b1 = linear(k1, hidden_size, hidden_size)
    w2, b2 = linear(k2, hidden_size, num_classes)
    return (w0, b0, w1, b1, w2, b2)


def reference_bf16(x, params):
    """JAX reference with the same bf16-matmul / f32-accumulate precision."""
    w0, b0, w1, b1, w2, b2 = params

    def mm(a, w):
        return jax.lax.dot(a.astype(jnp.bfloat16), w.astype(jnp.bfloat16),
                           preferred_element_type=jnp.float32)

    h = jax.nn.relu(mm(x, w0) + b0)
    h = jax.nn.relu(mm(h, w1) + b1)
    logits = mm(h, w2) + b2
    return jax.nn.log_softmax(logits, axis=1)


def reference_f32(x, params):
    w0, b0, w1, b1, w2, b2 = params
    h = jax.nn.relu(x @ w0 + b0)
    h = jax.nn.relu(h @ w1 + b1)
    logits = h @ w2 + b2
    return jax.nn.log_softmax(logits, axis=1)


if __name__ == "__main__":
    # Small shapes consistent with the module (scaled down from 1536/768/6).
    # batch=20 exercises both the >=2-grid-step clamp (default tile -> 16,
    # grid=(2,)) and the in-kernel padded-tail path, plus a 3-step run below.
    batch = 20
    input_size = 64
    hidden_size = 32
    num_classes = 6

    key = jax.random.PRNGKey(0)
    kx, kp = jax.random.split(key)
    x = jax.random.normal(kx, (batch, input_size), jnp.float32)
    params_f32 = init_params(kp, input_size, hidden_size, num_classes)
    params = prepare_params(params_f32)   # bf16 weight cast done once, not per call

    # Default tiling path (clamped tile, 2 grid steps, partial tail block).
    out = domain_discriminator(x, params)
    out = jax.block_until_ready(out)
    assert out.shape == (batch, num_classes)

    # Explicit small tile: 3 grid steps + partial tail.
    out_small = jax.block_until_ready(domain_discriminator(x, params, block_b=8))

    # Matches a JAX reference at the same (bf16 matmul, f32 accum) precision.
    ref = reference_bf16(x, params_f32)
    assert jnp.allclose(out, ref, atol=1e-3, rtol=1e-3), "mismatch vs bf16 JAX reference"
    assert jnp.allclose(out_small, ref, atol=1e-3, rtol=1e-3), "tiled-path mismatch"

    # Close to the full-f32 reference (bf16 MXU inputs introduce ~0.4% error).
    ref32 = reference_f32(x, params_f32)
    assert jnp.allclose(out, ref32, atol=3e-2, rtol=3e-2), "mismatch vs f32 JAX reference"

    # log_softmax rows should sum (in prob space) to ~1.
    assert jnp.allclose(jnp.sum(jnp.exp(out), axis=1), 1.0, atol=1e-5)

    # TODO(synk): training-mode Dropout (random mask) not implemented; eval-mode
    # identity matches the reference forward used here.

    print("KERNEL_OK")
</pallas_src>

<mosaic_0001>
module attributes {stable_mosaic.version = 11 : i64} {
  func.func @ddisc_kernel(%arg0: i32, %arg1: memref<16x64xf32, #tpu.memory_space<vmem>>, %arg2: memref<64x32xbf16, #tpu.memory_space<vmem>>, %arg3: memref<1x32xf32, #tpu.memory_space<vmem>>, %arg4: memref<32x32xbf16, #tpu.memory_space<vmem>>, %arg5: memref<1x32xf32, #tpu.memory_space<vmem>>, %arg6: memref<32x6xbf16, #tpu.memory_space<vmem>>, %arg7: memref<1x6xf32, #tpu.memory_space<vmem>>, %arg8: memref<16x6xf32, #tpu.memory_space<vmem>>) attributes {dimension_semantics = [#tpu.dimension_semantics<parallel>], iteration_bounds = array<i64: 2>, scalar_prefetch = 0 : i64, scratch_operands = 0 : i64, tpu.core_type = #tpu.core_type<tc>, window_params = [{transform_indices = @transform_0, window_bounds = array<i64: 16, 64>}, {pipeline_mode = #tpu.pipeline_mode<synchronous>, transform_indices = @transform_1, window_bounds = array<i64: 64, 32>}, {pipeline_mode = #tpu.pipeline_mode<synchronous>, transform_indices = @transform_2, window_bounds = array<i64: 1, 32>}, {pipeline_mode = #tpu.pipeline_mode<synchronous>, transform_indices = @transform_3, window_bounds = array<i64: 32, 32>}, {pipeline_mode = #tpu.pipeline_mode<synchronous>, transform_indices = @transform_4, window_bounds = array<i64: 1, 32>}, {pipeline_mode = #tpu.pipeline_mode<synchronous>, transform_indices = @transform_5, window_bounds = array<i64: 32, 6>}, {pipeline_mode = #tpu.pipeline_mode<synchronous>, transform_indices = @transform_6, window_bounds = array<i64: 1, 6>}, {transform_indices = @transform_7, window_bounds = array<i64: 16, 6>}]} {
    %c0 = arith.constant 0 : index
    %c0_0 = arith.constant 0 : index
    %0 = vector.load %arg1[%c0, %c0_0] : memref<16x64xf32, #tpu.memory_space<vmem>>, vector<16x64xf32>
    %1 = arith.truncf %0 : vector<16x64xf32> to vector<16x64xbf16>
    %c0_1 = arith.constant 0 : index
    %c0_2 = arith.constant 0 : index
    %2 = vector.load %arg2[%c0_1, %c0_2] : memref<64x32xbf16, #tpu.memory_space<vmem>>, vector<64x32xbf16>
    %cst = arith.constant dense<0.000000e+00> : vector<16x32xf32>
    %3 = tpu.matmul %1, %2, %cst {dimension_numbers = #tpu.dot_dimension_numbers<[1], [0], [0], [1], [0, 0, 1, 1], [], []>} : vector<16x64xbf16>, vector<64x32xbf16>, vector<16x32xf32> -> vector<16x32xf32>
    %c0_3 = arith.constant 0 : index
    %c0_4 = arith.constant 0 : index
    %4 = vector.load %arg3[%c0_3, %c0_4] : memref<1x32xf32, #tpu.memory_space<vmem>>, vector<1x32xf32>
    %5 = vector.broadcast %4 : vector<1x32xf32> to vector<16x32xf32>
    %6 = arith.addf %3, %5 : vector<16x32xf32>
    %cst_5 = arith.constant 0.000000e+00 : f32
    %7 = vector.broadcast %cst_5 : f32 to vector<16x32xf32>
    %8 = arith.maximumf %6, %7 : vector<16x32xf32>
    %9 = arith.truncf %8 : vector<16x32xf32> to vector<16x32xbf16>
    %c0_6 = arith.constant 0 : index
    %c0_7 = arith.constant 0 : index
    %10 = vector.load %arg4[%c0_6, %c0_7] : memref<32x32xbf16, #tpu.memory_space<vmem>>, vector<32x32xbf16>
    %cst_8 = arith.constant dense<0.000000e+00> : vector<16x32xf32>
    %11 = tpu.matmul %9, %10, %cst_8 {dimension_numbers = #tpu.dot_dimension_numbers<[1], [0], [0], [1], [0, 0, 1, 1], [], []>} : vector<16x32xbf16>, vector<32x32xbf16>, vector<16x32xf32> -> vector<16x32xf32>
    %c0_9 = arith.constant 0 : index
    %c0_10 = arith.constant 0 : index
    %12 = vector.load %arg5[%c0_9, %c0_10] : memref<1x32xf32, #tpu.memory_space<vmem>>, vector<1x32xf32>
    %13 = vector.broadcast %12 : vector<1x32xf32> to vector<16x32xf32>
    %14 = arith.addf %11, %13 : vector<16x32xf32>
    %cst_11 = arith.constant 0.000000e+00 : f32
    %15 = vector.broadcast %cst_11 : f32 to vector<16x32xf32>
    %16 = arith.maximumf %14, %15 : vector<16x32xf32>
    %17 = arith.truncf %16 : vector<16x32xf32> to vector<16x32xbf16>
    %c0_12 = arith.constant 0 : index
    %c0_13 = arith.constant 0 : index
    %18 = vector.load %arg6[%c0_12, %c0_13] : memref<32x6xbf16, #tpu.memory_space<vmem>>, vector<32x6xbf16>
    %cst_14 = arith.constant dense<0.000000e+00> : vector<16x6xf32>
    %19 = tpu.matmul %17, %18, %cst_14 {dimension_numbers = #tpu.dot_dimension_numbers<[1], [0], [0], [1], [0, 0, 1, 1], [], []>} : vector<16x32xbf16>, vector<32x6xbf16>, vector<16x6xf32> -> vector<16x6xf32>
    %c0_15 = arith.constant 0 : index
    %c0_16 = arith.constant 0 : index
    %20 = vector.load %arg7[%c0_15, %c0_16] : memref<1x6xf32, #tpu.memory_space<vmem>>, vector<1x6xf32>
    %21 = vector.broadcast %20 : vector<1x6xf32> to vector<16x6xf32>
    %22 = arith.addf %19, %21 : vector<16x6xf32>
    %cst_17 = arith.constant dense<0xFF800000> : vector<16xf32>
    %23 = vector.multi_reduction <maximumf>, %22, %cst_17 [1] : vector<16x6xf32> to vector<16xf32>
    %24 = vector.shape_cast %23 : vector<16xf32> to vector<16x1xf32>
    %25 = vector.broadcast %24 : vector<16x1xf32> to vector<16x6xf32>
    %26 = arith.subf %22, %25 : vector<16x6xf32>
    %27 = math.exp %26 : vector<16x6xf32>
    %cst_18 = arith.constant dense<0.000000e+00> : vector<16xf32>
    %28 = vector.multi_reduction <add>, %27, %cst_18 [1] : vector<16x6xf32> to vector<16xf32>
    %29 = vector.shape_cast %28 : vector<16xf32> to vector<16x1xf32>
    %30 = math.log %29 : vector<16x1xf32>
    %31 = vector.broadcast %30 : vector<16x1xf32> to vector<16x6xf32>
    %32 = arith.subf %26, %31 : vector<16x6xf32>
    %c0_19 = arith.constant 0 : index
    %c0_20 = arith.constant 0 : index
    %33 = vector.load %arg8[%c0_19, %c0_20] : memref<16x6xf32, #tpu.memory_space<vmem>>, vector<16x6xf32>
    tpu.vector_store %arg8[%c0_19, %c0_20], %32 {strides = array<i32>} : memref<16x6xf32, #tpu.memory_space<vmem>>, vector<16x6xf32>,
    return
  }
  func.func @transform_0(%arg0: i32) -> (i32, i32) {
    %c0_i32 = arith.constant 0 : i32
    %c0_i32_0 = arith.constant 0 : i32
    return %arg0, %c0_i32 : i32, i32
  }
  func.func @transform_1(%arg0: i32) -> (i32, i32) {
    %c0_i32 = arith.constant 0 : i32
    %c0_i32_0 = arith.constant 0 : i32
    %c0_i32_1 = arith.constant 0 : i32
    return %c0_i32, %c0_i32_0 : i32, i32
  }
  func.func @transform_2(%arg0: i32) -> (i32, i32) {
    %c0_i32 = arith.constant 0 : i32
    %c0_i32_0 = arith.constant 0 : i32
    %c0_i32_1 = arith.constant 0 : i32
    return %c0_i32, %c0_i32_0 : i32, i32
  }
  func.func @transform_3(%arg0: i32) -> (i32, i32) {
    %c0_i32 = arith.constant 0 : i32
    %c0_i32_0 = arith.constant 0 : i32
    %c0_i32_1 = arith.constant 0 : i32
    return %c0_i32, %c0_i32_0 : i32, i32
  }
  func.func @transform_4(%arg0: i32) -> (i32, i32) {
    %c0_i32 = arith.constant 0 : i32
    %c0_i32_0 = arith.constant 0 : i32
    %c0_i32_1 = arith.constant 0 : i32
    return %c0_i32, %c0_i32_0 : i32, i32
  }
  func.func @transform_5(%arg0: i32) -> (i32, i32) {
    %c0_i32 = arith.constant 0 : i32
    %c0_i32_0 = arith.constant 0 : i32
    %c0_i32_1 = arith.constant 0 : i32
    return %c0_i32, %c0_i32_0 : i32, i32
  }
  func.func @transform_6(%arg0: i32) -> (i32, i32) {
    %c0_i32 = arith.constant 0 : i32
    %c0_i32_0 = arith.constant 0 : i32
    %c0_i32_1 = arith.constant 0 : i32
    return %c0_i32, %c0_i32_0 : i32, i32
  }
  func.func @transform_7(%arg0: i32) -> (i32, i32) {
    %c0_i32 = arith.constant 0 : i32
    %c0_i32_0 = arith.constant 0 : i32
    return %arg0, %c0_i32 : i32, i32
  }
}

</mosaic_0001>

<bundles_post_ra>
// kernel: tpu_custom_call.1
= control target key start
LH: loop header
LB: loop body
LE: loop exit
PB: predicated region body
PF: predicated region fallthrough
CT: control target
= control target key end

     0   :  { %s983_s24 = smov 0   ;;  %s985_s25 = smov 0   ;;  %s1105_s0 = inlined_call_operand.vmem [shape: f32[20,64], index: 0, kind: input, shape index: {}]   ;;  %s1106_s1 = inlined_call_operand.vmem [shape: bf16[64,32], index: 1, kind: input, shape index: {}]   ;;  %s1107_s2 = inlined_call_operand.vmem [shape: f32[1,32], index: 2, kind: input, shape index: {}]   ;;  %s1108_s3 = inlined_call_operand.vmem [shape: bf16[32,32], index: 3, kind: input, shape index: {}]   ;;  %s1109_s4 = inlined_call_operand.vmem [shape: f32[1,32], index: 4, kind: input, shape index: {}]   ;;  %s1110_s5 = inlined_call_operand.vmem [shape: bf16[32,6], index: 5, kind: input, shape index: {}]   ;;  %s1111_s6 = inlined_call_operand.vmem [shape: f32[1,6], index: 6, kind: input, shape index: {}]   ;;  %s1112_s7 = inlined_call_operand.vmem [shape: f32[20,6], index: 7, kind: output, shape index: {}]  }
   0x1   :  { %s987_s26 = smov 0  }
   0x2 LB: > { %s996_s27 = sadd.s32 4294967295, %s909_s26   ;;  %s998_s28 = sadd.s32 1, %s909_s26   ;;  %s909_s26 = sphi %s987_s26, %s1116_s26   ;;  %s905_s25 = sphi %s985_s25, %s1115_s25   ;;  %s901_s24 = sphi %s983_s24, %s1114_s24  }
   0x3   : > { %s173_s29 = ssub.s32 %s909_s26, %s998_s28  ;;  %s176_s30 = sadd.s32 1, %s905_s25 }
   0x4   : > { %p174_p0 = scmp.eq.s32.totalorder %s173_s29, 0  ;;  %p186_p1 = scmp.ne.s32.totalorder %s905_s25, %s901_s24 }
   0x5   : > { %p187_p2 = scmp.eq.s32.totalorder %s996_s27, 1  ;;  %p689_p3 = scmp.ge.s32.totalorder %s909_s26, 1 }
   0x6   : > { %s1006_s8 = scalar_select %p174_p0, %s905_s25, %s176_s30  }
   0x7   : > { %p1008_p4 = por %p187_p2, %p186_p1  ;;  %p246_p5 = scmp.lt.s32.totalorder %s909_s26, 3 }
   0x9   : > { %p247_p6 = pnand %p689_p3, %p246_p5 }
   0xa   : > { %s1016_s12 = sshll.u32 (!%p247_p6), %s996_s27, 1  ;;  %s278_s22 = sand.u32 (!%p247_p6), 1, %s901_s24  }
   0xb   : > { %250 = sbr.rel (%p247_p6) target bundleno = 750 (0x2ee), region = 48  ;;  %p286_p7 = scmp.lt.s32.totalorder (!%p247_p6), %s1016_s12, 2 }
   0xc   : > { %s690_s23 = sshll.u32 (!%p247_p6), %s278_s22, 4 }
   0xd   : > { %s1058_s26 = scalar_lea.vmem (!%p247_p6), [#allocation2], %s690_s23  }
  0x10   : > { %v748_v0 = vld [vmem:[%s1106_s1 + $0x18] sm:$0xff]  ;;  %v747_v1 = vld [vmem:[%s1106_s1 + $0x10] sm:$0xff]  ;;  %s287_s15 = scalar_select %p286_p7, %s1016_s12, 2  ;;  %v746_v2 = vld [vmem:[%s1106_s1 + $0x8] sm:$0xff]  ;;  %vm340_vm0 = vcmask 523264   ;;  %vm381_vm1 = vcmask 261120  }
  0x11   : > { %348 = vmatpush.bf16.msra.mxu0 %v748_v0  ;;  %v745_v3 = vld [vmem:[%s1106_s1] sm:$0xff]  ;;  %v750_v7 = vld [vmem:[%s1108_s3 + $0x8] sm:$0xff]  ;;  %vm439_vm2 = vcmask 48128   ;;  %s474_s24 = ssub.s32 (%p1008_p4), 3, %s1016_s12  ;;  %s753_s29 = sshll.u32 (%p1008_p4), %s996_s27, 4 }
  0x12   : > { %s692_s16 = sshll.u32 %s287_s15, 3  ;;  %391 = vmatpush.bf16.msra.mxu1 %v750_v7  ;;  %v749_v8 = vld [vmem:[%s1108_s3] sm:$0xff]  ;;  %v752_v17 = vld [vmem:[%s1110_s5 + $0x8] sm:$0xff]  ;;  %p475_p8 = scmp.lt.s32.totalorder (%p1008_p4), %s474_s24, 2 }
  0x13   : > { %s289_s21 = scalar_lea.vmem %s1105_s0, %s692_s16  ;;  %v844_v10 = vld [vmem:[%s1107_s2] ss:$0 sm:$0xff]  ;;  %431 = vmatpush.bf16.msra.mxu2 %v752_v17  ;;  %s1071_s11 = scalar_lea.vmem (%p1008_p4), %s1112_s7, %s753_s29  }
  0x14   : > { %v301_v4 = vld [vmem:[%s289_s21] sm:$0xff]  ;;  %v302_v5 = vld [vmem:[%s289_s21 + $0x8] sm:$0xff] }
  0x15   : > { %349 = vmatpush.bf16.msra.mxu0 %v747_v1  ;;  %v303_v6 = vpack.c.bf16 %v302_v5, %v301_v4  ;;  %v751_v18 = vld [vmem:[%s1110_s5] sm:$0xff] }
  0x16   : > { %392 = vmatpush.bf16.msra.mxu1 %v749_v8  ;;  %v845_v20 = vld [vmem:[%s1109_s4] ss:$0 sm:$0xff] }
  0x17   : > { %432 = vmatpush.bf16.msra.mxu2 %v751_v18  ;;  %v846_v27 = vld [vmem:[%s1111_s6] ss:$0 sm:$0xff] }
  0x19   : > { %350 = vmatpush.bf16.msra.mxu0 %v746_v2 }
  0x1d   : > { %351 = vmatpush.bf16.msra.mxu0 %v745_v3 }
  0x20   : > { %709 = vmatmul.msk.bf16.vlgmr.msra.gmra.mxu0 %vm340_vm0, %v303_v6 }
  0x9d   : > { %v353_v9 = vpop.f32.mrf.mxu0 }
  0x9e   : > { %v354_v11 = vadd.f32 %v844_v10, %v353_v9 }
  0xa0   : > { %v358_v14 = vmax.f32 %v354_v11, 0.0 }
  0xa5   : > { %v355_v12 = vpop.f32.mrf.mxu0 }
  0xa6   : > { %v356_v13 = vadd.f32 %v844_v10, %v355_v12 }
  0xa8   : > { %v359_v15 = vmax.f32 %v356_v13, 0.0 }
  0xaa   : > { %v360_v16 = vpack.c.bf16 %v359_v15, %v358_v14 }
  0xac   : > { %718 = vmatmul.msk.bf16.vlgmr.msra.gmra.mxu1 %vm381_vm1, %v360_v16 }
 0x129   : > { %v394_v19 = vpop.f32.mrf.mxu1 }
 0x12a   : > { %v395_v21 = vadd.f32 %v845_v20, %v394_v19 }
 0x12c   : > { %v399_v24 = vmax.f32 %v395_v21, 0.0 }
 0x131   : > { %v396_v22 = vpop.f32.mrf.mxu1 }
 0x132   : > { %v397_v23 = vadd.f32 %v845_v20, %v396_v22 }
 0x134   : > { %v400_v25 = vmax.f32 %v397_v23, 0.0 }
 0x136   : > { %v401_v26 = vpack.c.bf16 %v400_v25, %v399_v24 }
 0x138   : > { %727 = vmatmul.msk.bf16.vlgmr.msra.gmra.mxu2 %vm381_vm1, %v401_v26 }
 0x1bb   : > { %v434_v28 = vpop.f32.mrf.mxu2 }
 0x1bc   : > { %v435_v29 = vadd.f32 %v846_v27, %v434_v28 }
 0x1be   : > { %v440_v30 = vsel %vm439_vm2, %v435_v29, -inf }
 0x1bf   : > { %441 = vmax.xlane.f32.xlu0 %v440_v30 }
 0x1c3   : > { %v436_v31 = vpop.f32.mrf.mxu2 }
 0x1c4   : > { %v437_v32 = vadd.f32 %v846_v27, %v436_v31 }
 0x1c6   : > { %v443_v33 = vsel %vm439_vm2, %v437_v32, -inf }
 0x1c7   : > { %444 = vmax.xlane.f32.xlu0 %v443_v33 }
 0x232   : > { %v442_v34 = vpop.xlane.xlu0 %441 }
 0x233   : > { %v446_v35 = vsub.f32 %v435_v29, %v442_v34 }
 0x235   : > { %v448_v36 = vmul.f32 1.442695, %v446_v35 }
 0x237   : > { %847 = vpow2.f32 %v448_v36 }
 0x23a   : > { %v445_v37 = vpop.xlane.xlu0 %444 }
 0x23b   : > { %v447_v38 = vsub.f32 %v437_v32, %v445_v37 }
 0x23d   : > { %v848_v39 = vpop.eup %847  ;;  %v450_v40 = vmul.f32 1.442695, %v447_v38 }
 0x23e   : > { %v452_v41 = vsel %vm439_vm2, %v848_v39, 0.0 }
 0x23f   : > { %849 = vpow2.f32 %v450_v40  ;;  %453 = vadd.xlane.f32.xlu1 %v452_v41 }
 0x245   : > { %v850_v42 = vpop.eup %849 }
 0x246   : > { %v455_v43 = vsel %vm439_vm2, %v850_v42, 0.0 }
 0x247   : > { %456 = vadd.xlane.f32.xlu1 %v455_v43 }
 0x2b2   : > { %v454_v44 = vpop.xlane.xlu1 %453 }
 0x2b3   : > { %851 = vlog2.f32 %v454_v44 }
 0x2b9   : > { %v852_v45 = vpop.eup %851 }
 0x2ba   : > { %v459_v46 = vmul.f32 0.6931472, %v852_v45  ;;  %v457_v47 = vpop.xlane.xlu1 %456 }
 0x2bb   : > { %853 = vlog2.f32 %v457_v47 }
 0x2bc   : > { %v462_v48 = vsub.f32 %v446_v35, %v459_v46 }
 0x2be   : > { %464 = vst.msk [vmem:[%s1058_s26] sm:$0xff] %vm439_vm2, %v462_v48 }
 0x2c1   : > { %v854_v49 = vpop.eup %853 }
 0x2c2   : > { %v461_v50 = vmul.f32 0.6931472, %v854_v49  ;;  %472 = sbr.rel (!%p1008_p4) target bundleno = 750 (0x2ee), region = 52 }
 0x2c4   : > { %v463_v51 = vsub.f32 %v447_v38, %v461_v50 }
 0x2c6   : > { %465 = vst.msk [vmem:[%s1058_s26 + $0x8] sm:$0xff] %vm439_vm2, %v463_v51 }
 0x2c7   : > { %s1118_s24 = smov (!%p475_p8, %s474_s24), 2 }
 0x2c8   : > { %s730_s13 = sshll.u32 %s1118_s24, 3 }
 0x2c9   : > { %p733_p9 = scmp.eq.s32.totalorder %s730_s13, 0 }
 0x2ca   : > { %s1077_s14 = sshrl.u32 (!%p733_p9), %s1118_s24, 1 }
 0x2cb   : > { %483 = sbr.rel (%p733_p9) target bundleno = 750 (0x2ee), region = 56  ;;  %p734_p10 = scmp.le.s32.totalorder (!%p733_p9), %s1077_s14, 0 }
 0x2d0   : > { %642 = sbr.rel (%p734_p10) target bundleno = 733 (0x2dd), region = 132  ;;  %s911_s27 = smov (!%p734_p10), %s1071_s11  }
 0x2d1   : > { %s915_s9 = smov (!%p734_p10), %s1058_s26   ;;  %s919_s12 = smov (!%p734_p10), 0  }
 0x2d2   : > { %s923_s15 = smov (!%p734_p10), 0  }
 0x2d5 LB: >> { %v548_v52 = vld [vmem:[%s917_s9] sm:$0xff]  ;;  %v550_v53 = vld [vmem:[%s917_s9 + $0x8] sm:$0xff]  ;;  %s552_s16 = sadd.s32 1, %s921_s12  ;;  %s542_s15 = sadd.s32 1, %s925_s15   ;;  %s925_s15 = sphi %s923_s15, %s542_s15   ;;  %s921_s12 = sphi %s919_s12, %s920_s12   ;;  %s917_s9 = sphi %s915_s9, %s557_s9   ;;  %s913_s27 = sphi %s911_s27, %s558_s27  }
 0x2d6   : >> { %549 = vst [vmem:[%s913_s27] sm:$0xff] %v548_v52  ;;  %p553_p11 = scmp.ge.s32.totalorder %s552_s16, %s1077_s14  ;;  %p541_p12 = scmp.ge.s32.totalorder %s542_s15, %s1077_s14 }
 0x2d7   : >> { %551 = vst [vmem:[%s913_s27 + $0x8] sm:$0xff] %v550_v53 }
 0x2d8   : >> { %s1120_s16 = smov (%p553_p11, %s552_s16), 0  ;;  %544 = sbr.rel (!%p541_p12) target bundleno = 725 (0x2d5), region = 138 }
 0x2d9   : >> { %s735_s17 = sshll.u32 %s1120_s16, 4  ;;  %s920_s12 = smov %s1120_s16  }
 0x2da   : >> { %s557_s9 = scalar_lea.vmem %s1058_s26, %s735_s17 [#allocation2]   ;;  %s558_s27 = scalar_lea.vmem %s1071_s11, %s735_s17  }
 0x2dd PF: > { %s1087_s18 = sand.u32 1, %s1118_s24   ;;  %s754_s19 = sshll.u32 %s1077_s14, 4 }
 0x2de   : > { %s563_s20 = scalar_lea.vmem %s1058_s26, %s754_s19 [#allocation2]   ;;  %s565_s21 = scalar_lea.vmem %s1071_s11, %s754_s19  }
 0x2df   : > { %p740_p13 = scmp.le.s32.totalorder %s1087_s18, 0 }
 0x2e0   : > { %s927_s22 = smov (!%p740_p13), %s565_s21   ;;  %s931_s23 = smov (!%p740_p13), %s563_s20  }
 0x2e1   : > { %656 = sbr.rel (%p740_p13) target bundleno = 750 (0x2ee), region = 143  ;;  %s935_s29 = smov (!%p740_p13), 0  }
 0x2e2   : > { %s939_s30 = smov (!%p740_p13), 0  }
 0x2e6 LB: >> { %v575_v54 = vld [vmem:[%s933_s23] sm:$0xff]  ;;  %s577_s24 = sadd.s32 1, %s937_s29  ;;  %s569_s30 = sadd.s32 1, %s941_s30   ;;  %s941_s30 = sphi %s939_s30, %s569_s30   ;;  %s937_s29 = sphi %s935_s29, %s936_s29   ;;  %s933_s23 = sphi %s931_s23, %s582_s23   ;;  %s929_s22 = sphi %s927_s22, %s583_s22  }
 0x2e7   : >> { %576 = vst [vmem:[%s929_s22] sm:$0xff] %v575_v54  ;;  %p578_p0 = scmp.ge.s32.totalorder %s577_s24, %s1087_s18  ;;  %p568_p1 = scmp.ge.s32.totalorder %s569_s30, %s1087_s18 }
 0x2e9   : >> { %s1122_s24 = smov (%p578_p0, %s577_s24), 0  ;;  %571 = sbr.rel (!%p568_p1) target bundleno = 742 (0x2e6), region = 149 }
 0x2ea   : >> { %s741_s26 = sshll.u32 %s1122_s24, 3  ;;  %s936_s29 = smov %s1122_s24  }
 0x2eb   : >> { %s582_s23 = scalar_lea.vmem %s563_s20, %s741_s26 [#allocation2]   ;;  %s583_s22 = scalar_lea.vmem %s565_s21, %s741_s26  }
 0x2ee PF: > { %p14_p2 = scmp.ge.s32.totalorder %s998_s28, 4   ;;  %s1114_s24 = smov %s905_s25 }
 0x2ef   : > { %s1115_s25 = smov %s1006_s8  ;;  %s1116_s26 = smov %s998_s28 }
 0x2f0   :  { %16 = sbr.rel (!%p14_p2) target bundleno = 2 (0x2), region = 160 }

</bundles_post_ra>
